<compile_context>
chip_gen: v5e
topology: v5e:2x2
jax: 0.10.0
libtpu: 0.0.40
codegen_flags: <defaults>
</compile_context>

<pallas_src>
import functools

import jax
import jax.numpy as jnp
from jax import lax
from jax.experimental import pallas as pl
from jax.experimental.pallas import tpu as pltpu

F_PAD = 128  # lane-dense feature width (all logical feature dims here are <= 16)

_VMEM = pl.BlockSpec(memory_space=pltpu.MemorySpace.VMEM)


# ---------------------------------------------------------------------------
# Fused Pallas kernel: 3 GAT layers (+ReLU) + mean pool + dense1/ReLU + dense2 + softmax
# ---------------------------------------------------------------------------
def _gnn_fused_kernel(num_layers, num_classes,
                      x_ref, adj_ref, pool_ref,
                      w_ref, adst_ref, asrc_ref, b_ref,
                      w1_ref, b1_ref, w2_ref, b2_ref,
                      out_ref):
    """x_ref    : [N, F_PAD]    node features, feature dim zero-padded to 128 lanes
       adj_ref  : [N, N]        adj[i, j] = 1 iff edge j->i (self loops included)
       pool_ref : [G, N]        row g = 1/|graph g| over its nodes
       w_ref    : [L, F_PAD, F_PAD]   per-layer GAT weight (zero padded)
       adst_ref : [L, F_PAD, 1]       a_dst as a column
       asrc_ref : [L, 1, F_PAD]       a_src as a row
       b_ref    : [L, 1, F_PAD]       per-layer bias
       w1/b1/w2/b2 : padded MLP head params
       out_ref  : [G, F_PAD]    softmax probs in lanes [0, num_classes), zeros elsewhere
    """
    neg = jnp.float32(-1e30)
    adj = adj_ref[...]
    mask = adj > 0.0                              # computed once, reused by all layers
    h = x_ref[...]                                # [N, F_PAD]

    for l in range(num_layers):                   # static unroll (num_layers = 3)
        w = w_ref[l]                              # [F_PAD, F_PAD]
        hw = jnp.dot(h, w, preferred_element_type=jnp.float32)               # [N, F_PAD]
        # attention scores via tiny MXU matmuls (no cross-lane reduce on the VALU/XLU path)
        e_dst = jnp.dot(hw, adst_ref[l], preferred_element_type=jnp.float32)  # [N, 1]
        e_src = lax.dot_general(asrc_ref[l], hw, (((1,), (1,)), ((), ())),
                                preferred_element_type=jnp.float32)           # [1, N]
        logits = e_dst + e_src                                                 # [N, N]
        logits = jnp.where(logits > 0, logits, 0.2 * logits)                   # LeakyReLU(0.2)
        masked = jnp.where(mask, logits, neg)
        m = jnp.max(masked, axis=-1, keepdims=True)
        p = jnp.where(mask, jnp.exp(masked - m), 0.0)
        denom = jnp.sum(p, axis=-1, keepdims=True)
        alpha = p * pl.reciprocal(denom, approx=True)                          # EUP slot
        h = jnp.dot(alpha, hw, preferred_element_type=jnp.float32) + b_ref[l]
        h = jnp.maximum(h, 0.0)                                                # fused ReLU

    # head: global_mean_pool -> dense1 -> ReLU -> (dropout = identity) -> dense2 -> softmax
    pooled = jnp.dot(pool_ref[...], h, preferred_element_type=jnp.float32)     # [G, F_PAD]
    z = jnp.dot(pooled, w1_ref[...], preferred_element_type=jnp.float32) + b1_ref[...]
    z = jnp.maximum(z, 0.0)
    logits2 = jnp.dot(z, w2_ref[...], preferred_element_type=jnp.float32) + b2_ref[...]
    lane = lax.broadcasted_iota(jnp.int32, logits2.shape, 1)
    valid = lane < num_classes                    # mask padded logit lanes out of the softmax
    logits2 = jnp.where(valid, logits2, neg)
    m2 = jnp.max(logits2, axis=-1, keepdims=True)
    e2 = jnp.where(valid, jnp.exp(logits2 - m2), 0.0)
    s2 = jnp.sum(e2, axis=-1, keepdims=True)
    out_ref[...] = e2 * pl.reciprocal(s2, approx=False)   # exact: rows sum to 1 within 1e-5


# ---------------------------------------------------------------------------
# Wrapper
# ---------------------------------------------------------------------------
def _pad2(a, rows, cols):
    return jnp.pad(a, ((0, rows - a.shape[0]), (0, cols - a.shape[1])))


def gnn_forward(x, edge_index, batch_index, params, num_graphs):
    """Full GNN.forward: 3 GAT layers + ReLU + mean pool -> MLP head, one fused kernel."""
    n, _ = x.shape
    num_layers = len(params["gat"])
    num_classes = params["gat"][-1][0].shape[1]

    # Glue (plain JAX): dense adjacency with self loops, per-graph mean-pool matrix.
    adj = jnp.zeros((n, n), jnp.float32)
    adj = adj.at[edge_index[1], edge_index[0]].set(1.0)
    adj = adj.at[jnp.arange(n), jnp.arange(n)].set(1.0)
    onehot = (batch_index[None, :] == jnp.arange(num_graphs)[:, None]).astype(jnp.float32)
    pool = onehot / jnp.sum(onehot, axis=1, keepdims=True)

    # Pad everything to lane-dense (last dim = F_PAD) shapes; padding is exact zeros.
    x_pad = _pad2(x, n, F_PAD)
    w_all = jnp.stack([_pad2(w, F_PAD, F_PAD) for (w, _, _, _) in params["gat"]])
    adst_all = jnp.stack([_pad2(a_dst.T, F_PAD, 1) for (_, _, a_dst, _) in params["gat"]])
    asrc_all = jnp.stack([_pad2(a_src, 1, F_PAD) for (_, a_src, _, _) in params["gat"]])
    b_all = jnp.stack([_pad2(b, 1, F_PAD) for (_, _, _, b) in params["gat"]])
    w1p = _pad2(params["w1"], F_PAD, F_PAD)
    b1p = _pad2(params["b1"], 1, F_PAD)
    w2p = _pad2(params["w2"], F_PAD, F_PAD)
    b2p = _pad2(params["b2"], 1, F_PAD)

    kernel = functools.partial(_gnn_fused_kernel, num_layers, num_classes)
    out_pad = pl.pallas_call(
        kernel,
        out_shape=jax.ShapeDtypeStruct((num_graphs, F_PAD), jnp.float32),
        in_specs=[_VMEM] * 11,
        out_specs=_VMEM,
    )(x_pad, adj, pool, w_all, adst_all, asrc_all, b_all, w1p, b1p, w2p, b2p)
    return out_pad[:, :num_classes]


# ---------------------------------------------------------------------------
# Deterministic parameter init (mirrors the PyTorch module's layer sizing)
# ---------------------------------------------------------------------------
def init_params(key, num_features, num_classes, num_layers=3):
    params = {"gat": []}
    fin = num_features
    for i in range(num_layers):
        fout = fin * 2 if i < num_layers - 1 else num_classes
        key, k1, k2, k3 = jax.random.split(key, 4)
        w = 0.3 * jax.random.normal(k1, (fin, fout), jnp.float32)
        a_src = 0.3 * jax.random.normal(k2, (1, fout), jnp.float32)
        a_dst = 0.3 * jax.random.normal(k3, (1, fout), jnp.float32)
        b = jnp.zeros((1, fout), jnp.float32)
        params["gat"].append((w, a_src, a_dst, b))
        fin = fout
    key, k4, k5 = jax.random.split(key, 3)
    params["w1"] = 0.3 * jax.random.normal(k4, (num_classes, num_classes * 2), jnp.float32)
    params["b1"] = jnp.zeros((1, num_classes * 2), jnp.float32)
    params["w2"] = 0.3 * jax.random.normal(k5, (num_classes * 2, num_classes), jnp.float32)
    params["b2"] = jnp.zeros((1, num_classes), jnp.float32)
    return params


# ---------------------------------------------------------------------------
# Main
# ---------------------------------------------------------------------------
if __name__ == "__main__":
    num_features = 4
    num_classes = 4
    num_layers = 3
    nodes_per_graph = 8
    num_graphs = 2
    n = nodes_per_graph * num_graphs  # 16 nodes total

    key = jax.random.PRNGKey(0)
    key, kx = jax.random.split(key)
    x = jax.random.normal(kx, (n, num_features), jnp.float32)

    # Two ring graphs (bidirectional edges), batch_index = graph id per node.
    srcs, dsts = [], []
    for g in range(num_graphs):
        base = g * nodes_per_graph
        for i in range(nodes_per_graph):
            a = base + i
            b = base + (i + 1) % nodes_per_graph
            srcs += [a, b]
            dsts += [b, a]
    edge_index = jnp.array([srcs, dsts], dtype=jnp.int32)           # [2, E]
    batch_index = jnp.repeat(jnp.arange(num_graphs, dtype=jnp.int32), nodes_per_graph)

    params = init_params(key, num_features, num_classes, num_layers)

    out = gnn_forward(x, edge_index, batch_index, params, num_graphs)
    out = jax.block_until_ready(out)

    assert out.shape == (num_graphs, num_classes)
    assert bool(jnp.all(jnp.isfinite(out)))
    # rows are softmax distributions
    assert bool(jnp.allclose(jnp.sum(out, axis=1), 1.0, atol=1e-5))
    print("KERNEL_OK")
</pallas_src>

<mosaic_0001>
module attributes {stable_mosaic.version = 11 : i64} {
  func.func @_gnn_fused_kernel(%arg0: memref<16x128xf32, #tpu.memory_space<vmem>>, %arg1: memref<16x16xf32, #tpu.memory_space<vmem>>, %arg2: memref<2x16xf32, #tpu.memory_space<vmem>>, %arg3: memref<3x128x128xf32, #tpu.memory_space<vmem>>, %arg4: memref<3x128x1xf32, #tpu.memory_space<vmem>>, %arg5: memref<3x1x128xf32, #tpu.memory_space<vmem>>, %arg6: memref<3x1x128xf32, #tpu.memory_space<vmem>>, %arg7: memref<128x128xf32, #tpu.memory_space<vmem>>, %arg8: memref<1x128xf32, #tpu.memory_space<vmem>>, %arg9: memref<128x128xf32, #tpu.memory_space<vmem>>, %arg10: memref<1x128xf32, #tpu.memory_space<vmem>>, %arg11: memref<2x128xf32, #tpu.memory_space<vmem>>) attributes {dimension_semantics = [], scalar_prefetch = 0 : i64, scratch_operands = 0 : i64, tpu.core_type = #tpu.core_type<tc>} {
    %c0 = arith.constant 0 : index
    %c0_0 = arith.constant 0 : index
    %0 = vector.load %arg1[%c0, %c0_0] : memref<16x16xf32, #tpu.memory_space<vmem>>, vector<16x16xf32>
    %cst = arith.constant 0.000000e+00 : f32
    %1 = vector.broadcast %cst : f32 to vector<16x16xf32>
    %2 = arith.cmpf ogt, %0, %1 : vector<16x16xf32>
    %c0_1 = arith.constant 0 : index
    %c0_2 = arith.constant 0 : index
    %3 = vector.load %arg0[%c0_1, %c0_2] : memref<16x128xf32, #tpu.memory_space<vmem>>, vector<16x128xf32>
    %c0_3 = arith.constant 0 : index
    %c0_4 = arith.constant 0 : index
    %c0_5 = arith.constant 0 : index
    %4 = vector.load %arg3[%c0_3, %c0_4, %c0_5] : memref<3x128x128xf32, #tpu.memory_space<vmem>>, vector<1x128x128xf32>
    %5 = vector.shape_cast %4 : vector<1x128x128xf32> to vector<128x128xf32>
    %cst_6 = arith.constant dense<0.000000e+00> : vector<16x128xf32>
    %6 = tpu.matmul %3, %5, %cst_6 {dimension_numbers = #tpu.dot_dimension_numbers<[1], [0], [0], [1], [0, 0, 1, 1], [], []>} : vector<16x128xf32>, vector<128x128xf32>, vector<16x128xf32> -> vector<16x128xf32>
    %c0_7 = arith.constant 0 : index
    %c0_8 = arith.constant 0 : index
    %c0_9 = arith.constant 0 : index
    %7 = vector.load %arg4[%c0_7, %c0_8, %c0_9] : memref<3x128x1xf32, #tpu.memory_space<vmem>>, vector<1x128x1xf32>
    %8 = vector.shape_cast %7 : vector<1x128x1xf32> to vector<128x1xf32>
    %cst_10 = arith.constant dense<0.000000e+00> : vector<16x1xf32>
    %9 = tpu.matmul %6, %8, %cst_10 {dimension_numbers = #tpu.dot_dimension_numbers<[1], [0], [0], [1], [0, 0, 1, 1], [], []>} : vector<16x128xf32>, vector<128x1xf32>, vector<16x1xf32> -> vector<16x1xf32>
    %c0_11 = arith.constant 0 : index
    %c0_12 = arith.constant 0 : index
    %c0_13 = arith.constant 0 : index
    %10 = vector.load %arg5[%c0_11, %c0_12, %c0_13] : memref<3x1x128xf32, #tpu.memory_space<vmem>>, vector<1x1x128xf32>
    %11 = vector.shape_cast %10 : vector<1x1x128xf32> to vector<1x128xf32>
    %cst_14 = arith.constant dense<0.000000e+00> : vector<1x16xf32>
    %12 = tpu.matmul %11, %6, %cst_14 {dimension_numbers = #tpu.dot_dimension_numbers<[1], [1], [0], [0], [0, 0, 1, 0], [], []>} : vector<1x128xf32>, vector<16x128xf32>, vector<1x16xf32> -> vector<1x16xf32>
    %13 = vector.broadcast %9 : vector<16x1xf32> to vector<16x16xf32>
    %14 = vector.broadcast %12 : vector<1x16xf32> to vector<16x16xf32>
    %15 = arith.addf %13, %14 : vector<16x16xf32>
    %cst_15 = arith.constant 0.000000e+00 : f32
    %16 = vector.broadcast %cst_15 : f32 to vector<16x16xf32>
    %17 = arith.cmpf ogt, %15, %16 : vector<16x16xf32>
    %cst_16 = arith.constant 2.000000e-01 : f32
    %18 = vector.broadcast %cst_16 : f32 to vector<16x16xf32>
    %19 = arith.mulf %18, %15 : vector<16x16xf32>
    %20 = arith.select %17, %15, %19 : vector<16x16xi1>, vector<16x16xf32>
    %cst_17 = arith.constant -1.000000e+30 : f32
    %21 = vector.broadcast %cst_17 : f32 to vector<16x16xf32>
    %22 = arith.select %2, %20, %21 : vector<16x16xi1>, vector<16x16xf32>
    %cst_18 = arith.constant dense<0xFF800000> : vector<16xf32>
    %23 = vector.multi_reduction <maximumf>, %22, %cst_18 [1] : vector<16x16xf32> to vector<16xf32>
    %24 = vector.shape_cast %23 : vector<16xf32> to vector<16x1xf32>
    %25 = vector.broadcast %24 : vector<16x1xf32> to vector<16x16xf32>
    %26 = arith.subf %22, %25 : vector<16x16xf32>
    %27 = math.exp %26 : vector<16x16xf32>
    %cst_19 = arith.constant 0.000000e+00 : f32
    %28 = vector.broadcast %cst_19 : f32 to vector<16x16xf32>
    %29 = arith.select %2, %27, %28 : vector<16x16xi1>, vector<16x16xf32>
    %cst_20 = arith.constant dense<0.000000e+00> : vector<16xf32>
    %30 = vector.multi_reduction <add>, %29, %cst_20 [1] : vector<16x16xf32> to vector<16xf32>
    %31 = vector.shape_cast %30 : vector<16xf32> to vector<16x1xf32>
    %32 = tpu.reciprocal %31 {approx = true} : vector<16x1xf32> -> vector<16x1xf32>
    %33 = vector.broadcast %32 : vector<16x1xf32> to vector<16x16xf32>
    %34 = arith.mulf %29, %33 : vector<16x16xf32>
    %cst_21 = arith.constant dense<0.000000e+00> : vector<16x128xf32>
    %35 = tpu.matmul %34, %6, %cst_21 {dimension_numbers = #tpu.dot_dimension_numbers<[1], [0], [0], [1], [0, 0, 1, 1], [], []>} : vector<16x16xf32>, vector<16x128xf32>, vector<16x128xf32> -> vector<16x128xf32>
    %c0_22 = arith.constant 0 : index
    %c0_23 = arith.constant 0 : index
    %c0_24 = arith.constant 0 : index
    %36 = vector.load %arg6[%c0_22, %c0_23, %c0_24] : memref<3x1x128xf32, #tpu.memory_space<vmem>>, vector<1x1x128xf32>
    %37 = vector.shape_cast %36 : vector<1x1x128xf32> to vector<1x128xf32>
    %38 = vector.broadcast %37 : vector<1x128xf32> to vector<16x128xf32>
    %39 = arith.addf %35, %38 : vector<16x128xf32>
    %cst_25 = arith.constant 0.000000e+00 : f32
    %40 = vector.broadcast %cst_25 : f32 to vector<16x128xf32>
    %41 = arith.maximumf %39, %40 : vector<16x128xf32>
    %c1 = arith.constant 1 : index
    %c0_26 = arith.constant 0 : index
    %c0_27 = arith.constant 0 : index
    %42 = vector.load %arg3[%c1, %c0_26, %c0_27] : memref<3x128x128xf32, #tpu.memory_space<vmem>>, vector<1x128x128xf32>
    %43 = vector.shape_cast %42 : vector<1x128x128xf32> to vector<128x128xf32>
    %cst_28 = arith.constant dense<0.000000e+00> : vector<16x128xf32>
    %44 = tpu.matmul %41, %43, %cst_28 {dimension_numbers = #tpu.dot_dimension_numbers<[1], [0], [0], [1], [0, 0, 1, 1], [], []>} : vector<16x128xf32>, vector<128x128xf32>, vector<16x128xf32> -> vector<16x128xf32>
    %c1_29 = arith.constant 1 : index
    %c0_30 = arith.constant 0 : index
    %c0_31 = arith.constant 0 : index
    %45 = vector.load %arg4[%c1_29, %c0_30, %c0_31] : memref<3x128x1xf32, #tpu.memory_space<vmem>>, vector<1x128x1xf32>
    %46 = vector.shape_cast %45 : vector<1x128x1xf32> to vector<128x1xf32>
    %cst_32 = arith.constant dense<0.000000e+00> : vector<16x1xf32>
    %47 = tpu.matmul %44, %46, %cst_32 {dimension_numbers = #tpu.dot_dimension_numbers<[1], [0], [0], [1], [0, 0, 1, 1], [], []>} : vector<16x128xf32>, vector<128x1xf32>, vector<16x1xf32> -> vector<16x1xf32>
    %c1_33 = arith.constant 1 : index
    %c0_34 = arith.constant 0 : index
    %c0_35 = arith.constant 0 : index
    %48 = vector.load %arg5[%c1_33, %c0_34, %c0_35] : memref<3x1x128xf32, #tpu.memory_space<vmem>>, vector<1x1x128xf32>
    %49 = vector.shape_cast %48 : vector<1x1x128xf32> to vector<1x128xf32>
    %cst_36 = arith.constant dense<0.000000e+00> : vector<1x16xf32>
    %50 = tpu.matmul %49, %44, %cst_36 {dimension_numbers = #tpu.dot_dimension_numbers<[1], [1], [0], [0], [0, 0, 1, 0], [], []>} : vector<1x128xf32>, vector<16x128xf32>, vector<1x16xf32> -> vector<1x16xf32>
    %51 = vector.broadcast %47 : vector<16x1xf32> to vector<16x16xf32>
    %52 = vector.broadcast %50 : vector<1x16xf32> to vector<16x16xf32>
    %53 = arith.addf %51, %52 : vector<16x16xf32>
    %cst_37 = arith.constant 0.000000e+00 : f32
    %54 = vector.broadcast %cst_37 : f32 to vector<16x16xf32>
    %55 = arith.cmpf ogt, %53, %54 : vector<16x16xf32>
    %cst_38 = arith.constant 2.000000e-01 : f32
    %56 = vector.broadcast %cst_38 : f32 to vector<16x16xf32>
    %57 = arith.mulf %56, %53 : vector<16x16xf32>
    %58 = arith.select %55, %53, %57 : vector<16x16xi1>, vector<16x16xf32>
    %cst_39 = arith.constant -1.000000e+30 : f32
    %59 = vector.broadcast %cst_39 : f32 to vector<16x16xf32>
    %60 = arith.select %2, %58, %59 : vector<16x16xi1>, vector<16x16xf32>
    %cst_40 = arith.constant dense<0xFF800000> : vector<16xf32>
    %61 = vector.multi_reduction <maximumf>, %60, %cst_40 [1] : vector<16x16xf32> to vector<16xf32>
    %62 = vector.shape_cast %61 : vector<16xf32> to vector<16x1xf32>
    %63 = vector.broadcast %62 : vector<16x1xf32> to vector<16x16xf32>
    %64 = arith.subf %60, %63 : vector<16x16xf32>
    %65 = math.exp %64 : vector<16x16xf32>
    %cst_41 = arith.constant 0.000000e+00 : f32
    %66 = vector.broadcast %cst_41 : f32 to vector<16x16xf32>
    %67 = arith.select %2, %65, %66 : vector<16x16xi1>, vector<16x16xf32>
    %cst_42 = arith.constant dense<0.000000e+00> : vector<16xf32>
    %68 = vector.multi_reduction <add>, %67, %cst_42 [1] : vector<16x16xf32> to vector<16xf32>
    %69 = vector.shape_cast %68 : vector<16xf32> to vector<16x1xf32>
    %70 = tpu.reciprocal %69 {approx = true} : vector<16x1xf32> -> vector<16x1xf32>
    %71 = vector.broadcast %70 : vector<16x1xf32> to vector<16x16xf32>
    %72 = arith.mulf %67, %71 : vector<16x16xf32>
    %cst_43 = arith.constant dense<0.000000e+00> : vector<16x128xf32>
    %73 = tpu.matmul %72, %44, %cst_43 {dimension_numbers = #tpu.dot_dimension_numbers<[1], [0], [0], [1], [0, 0, 1, 1], [], []>} : vector<16x16xf32>, vector<16x128xf32>, vector<16x128xf32> -> vector<16x128xf32>
    %c1_44 = arith.constant 1 : index
    %c0_45 = arith.constant 0 : index
    %c0_46 = arith.constant 0 : index
    %74 = vector.load %arg6[%c1_44, %c0_45, %c0_46] : memref<3x1x128xf32, #tpu.memory_space<vmem>>, vector<1x1x128xf32>
    %75 = vector.shape_cast %74 : vector<1x1x128xf32> to vector<1x128xf32>
    %76 = vector.broadcast %75 : vector<1x128xf32> to vector<16x128xf32>
    %77 = arith.addf %73, %76 : vector<16x128xf32>
    %cst_47 = arith.constant 0.000000e+00 : f32
    %78 = vector.broadcast %cst_47 : f32 to vector<16x128xf32>
    %79 = arith.maximumf %77, %78 : vector<16x128xf32>
    %c2 = arith.constant 2 : index
    %c0_48 = arith.constant 0 : index
    %c0_49 = arith.constant 0 : index
    %80 = vector.load %arg3[%c2, %c0_48, %c0_49] : memref<3x128x128xf32, #tpu.memory_space<vmem>>, vector<1x128x128xf32>
    %81 = vector.shape_cast %80 : vector<1x128x128xf32> to vector<128x128xf32>
    %cst_50 = arith.constant dense<0.000000e+00> : vector<16x128xf32>
    %82 = tpu.matmul %79, %81, %cst_50 {dimension_numbers = #tpu.dot_dimension_numbers<[1], [0], [0], [1], [0, 0, 1, 1], [], []>} : vector<16x128xf32>, vector<128x128xf32>, vector<16x128xf32> -> vector<16x128xf32>
    %c2_51 = arith.constant 2 : index
    %c0_52 = arith.constant 0 : index
    %c0_53 = arith.constant 0 : index
    %83 = vector.load %arg4[%c2_51, %c0_52, %c0_53] : memref<3x128x1xf32, #tpu.memory_space<vmem>>, vector<1x128x1xf32>
    %84 = vector.shape_cast %83 : vector<1x128x1xf32> to vector<128x1xf32>
    %cst_54 = arith.constant dense<0.000000e+00> : vector<16x1xf32>
    %85 = tpu.matmul %82, %84, %cst_54 {dimension_numbers = #tpu.dot_dimension_numbers<[1], [0], [0], [1], [0, 0, 1, 1], [], []>} : vector<16x128xf32>, vector<128x1xf32>, vector<16x1xf32> -> vector<16x1xf32>
    %c2_55 = arith.constant 2 : index
    %c0_56 = arith.constant 0 : index
    %c0_57 = arith.constant 0 : index
    %86 = vector.load %arg5[%c2_55, %c0_56, %c0_57] : memref<3x1x128xf32, #tpu.memory_space<vmem>>, vector<1x1x128xf32>
    %87 = vector.shape_cast %86 : vector<1x1x128xf32> to vector<1x128xf32>
    %cst_58 = arith.constant dense<0.000000e+00> : vector<1x16xf32>
    %88 = tpu.matmul %87, %82, %cst_58 {dimension_numbers = #tpu.dot_dimension_numbers<[1], [1], [0], [0], [0, 0, 1, 0], [], []>} : vector<1x128xf32>, vector<16x128xf32>, vector<1x16xf32> -> vector<1x16xf32>
    %89 = vector.broadcast %85 : vector<16x1xf32> to vector<16x16xf32>
    %90 = vector.broadcast %88 : vector<1x16xf32> to vector<16x16xf32>
    %91 = arith.addf %89, %90 : vector<16x16xf32>
    %cst_59 = arith.constant 0.000000e+00 : f32
    %92 = vector.broadcast %cst_59 : f32 to vector<16x16xf32>
    %93 = arith.cmpf ogt, %91, %92 : vector<16x16xf32>
    %cst_60 = arith.constant 2.000000e-01 : f32
    %94 = vector.broadcast %cst_60 : f32 to vector<16x16xf32>
    %95 = arith.mulf %94, %91 : vector<16x16xf32>
    %96 = arith.select %93, %91, %95 : vector<16x16xi1>, vector<16x16xf32>
    %cst_61 = arith.constant -1.000000e+30 : f32
    %97 = vector.broadcast %cst_61 : f32 to vector<16x16xf32>
    %98 = arith.select %2, %96, %97 : vector<16x16xi1>, vector<16x16xf32>
    %cst_62 = arith.constant dense<0xFF800000> : vector<16xf32>
    %99 = vector.multi_reduction <maximumf>, %98, %cst_62 [1] : vector<16x16xf32> to vector<16xf32>
    %100 = vector.shape_cast %99 : vector<16xf32> to vector<16x1xf32>
    %101 = vector.broadcast %100 : vector<16x1xf32> to vector<16x16xf32>
    %102 = arith.subf %98, %101 : vector<16x16xf32>
    %103 = math.exp %102 : vector<16x16xf32>
    %cst_63 = arith.constant 0.000000e+00 : f32
    %104 = vector.broadcast %cst_63 : f32 to vector<16x16xf32>
    %105 = arith.select %2, %103, %104 : vector<16x16xi1>, vector<16x16xf32>
    %cst_64 = arith.constant dense<0.000000e+00> : vector<16xf32>
    %106 = vector.multi_reduction <add>, %105, %cst_64 [1] : vector<16x16xf32> to vector<16xf32>
    %107 = vector.shape_cast %106 : vector<16xf32> to vector<16x1xf32>
    %108 = tpu.reciprocal %107 {approx = true} : vector<16x1xf32> -> vector<16x1xf32>
    %109 = vector.broadcast %108 : vector<16x1xf32> to vector<16x16xf32>
    %110 = arith.mulf %105, %109 : vector<16x16xf32>
    %cst_65 = arith.constant dense<0.000000e+00> : vector<16x128xf32>
    %111 = tpu.matmul %110, %82, %cst_65 {dimension_numbers = #tpu.dot_dimension_numbers<[1], [0], [0], [1], [0, 0, 1, 1], [], []>} : vector<16x16xf32>, vector<16x128xf32>, vector<16x128xf32> -> vector<16x128xf32>
    %c2_66 = arith.constant 2 : index
    %c0_67 = arith.constant 0 : index
    %c0_68 = arith.constant 0 : index
    %112 = vector.load %arg6[%c2_66, %c0_67, %c0_68] : memref<3x1x128xf32, #tpu.memory_space<vmem>>, vector<1x1x128xf32>
    %113 = vector.shape_cast %112 : vector<1x1x128xf32> to vector<1x128xf32>
    %114 = vector.broadcast %113 : vector<1x128xf32> to vector<16x128xf32>
    %115 = arith.addf %111, %114 : vector<16x128xf32>
    %cst_69 = arith.constant 0.000000e+00 : f32
    %116 = vector.broadcast %cst_69 : f32 to vector<16x128xf32>
    %117 = arith.maximumf %115, %116 : vector<16x128xf32>
    %c0_70 = arith.constant 0 : index
    %c0_71 = arith.constant 0 : index
    %118 = vector.load %arg2[%c0_70, %c0_71] : memref<2x16xf32, #tpu.memory_space<vmem>>, vector<2x16xf32>
    %cst_72 = arith.constant dense<0.000000e+00> : vector<2x128xf32>
    %119 = tpu.matmul %118, %117, %cst_72 {dimension_numbers = #tpu.dot_dimension_numbers<[1], [0], [0], [1], [0, 0, 1, 1], [], []>} : vector<2x16xf32>, vector<16x128xf32>, vector<2x128xf32> -> vector<2x128xf32>
    %c0_73 = arith.constant 0 : index
    %c0_74 = arith.constant 0 : index
    %120 = vector.load %arg7[%c0_73, %c0_74] : memref<128x128xf32, #tpu.memory_space<vmem>>, vector<128x128xf32>
    %cst_75 = arith.constant dense<0.000000e+00> : vector<2x128xf32>
    %121 = tpu.matmul %119, %120, %cst_75 {dimension_numbers = #tpu.dot_dimension_numbers<[1], [0], [0], [1], [0, 0, 1, 1], [], []>} : vector<2x128xf32>, vector<128x128xf32>, vector<2x128xf32> -> vector<2x128xf32>
    %c0_76 = arith.constant 0 : index
    %c0_77 = arith.constant 0 : index
    %122 = vector.load %arg8[%c0_76, %c0_77] : memref<1x128xf32, #tpu.memory_space<vmem>>, vector<1x128xf32>
    %123 = vector.broadcast %122 : vector<1x128xf32> to vector<2x128xf32>
    %124 = arith.addf %121, %123 : vector<2x128xf32>
    %cst_78 = arith.constant 0.000000e+00 : f32
    %125 = vector.broadcast %cst_78 : f32 to vector<2x128xf32>
    %126 = arith.maximumf %124, %125 : vector<2x128xf32>
    %c0_79 = arith.constant 0 : index
    %c0_80 = arith.constant 0 : index
    %127 = vector.load %arg9[%c0_79, %c0_80] : memref<128x128xf32, #tpu.memory_space<vmem>>, vector<128x128xf32>
    %cst_81 = arith.constant dense<0.000000e+00> : vector<2x128xf32>
    %128 = tpu.matmul %126, %127, %cst_81 {dimension_numbers = #tpu.dot_dimension_numbers<[1], [0], [0], [1], [0, 0, 1, 1], [], []>} : vector<2x128xf32>, vector<128x128xf32>, vector<2x128xf32> -> vector<2x128xf32>
    %c0_82 = arith.constant 0 : index
    %c0_83 = arith.constant 0 : index
    %129 = vector.load %arg10[%c0_82, %c0_83] : memref<1x128xf32, #tpu.memory_space<vmem>>, vector<1x128xf32>
    %130 = vector.broadcast %129 : vector<1x128xf32> to vector<2x128xf32>
    %131 = arith.addf %128, %130 : vector<2x128xf32>
    %132 = tpu.iota {dimensions = array<i32: 1>} : vector<2x128xi32>
    %c4_i32 = arith.constant 4 : i32
    %133 = vector.broadcast %c4_i32 : i32 to vector<2x128xi32>
    %134 = arith.cmpi slt, %132, %133 : vector<2x128xi32>
    %cst_84 = arith.constant -1.000000e+30 : f32
    %135 = vector.broadcast %cst_84 : f32 to vector<2x128xf32>
    %136 = arith.select %134, %131, %135 : vector<2x128xi1>, vector<2x128xf32>
    %cst_85 = arith.constant dense<0xFF800000> : vector<2xf32>
    %137 = vector.multi_reduction <maximumf>, %136, %cst_85 [1] : vector<2x128xf32> to vector<2xf32>
    %138 = vector.shape_cast %137 : vector<2xf32> to vector<2x1xf32>
    %139 = vector.broadcast %138 : vector<2x1xf32> to vector<2x128xf32>
    %140 = arith.subf %136, %139 : vector<2x128xf32>
    %141 = math.exp %140 : vector<2x128xf32>
    %cst_86 = arith.constant 0.000000e+00 : f32
    %142 = vector.broadcast %cst_86 : f32 to vector<2x128xf32>
    %143 = arith.select %134, %141, %142 : vector<2x128xi1>, vector<2x128xf32>
    %cst_87 = arith.constant dense<0.000000e+00> : vector<2xf32>
    %144 = vector.multi_reduction <add>, %143, %cst_87 [1] : vector<2x128xf32> to vector<2xf32>
    %145 = vector.shape_cast %144 : vector<2xf32> to vector<2x1xf32>
    %146 = tpu.reciprocal %145 : vector<2x1xf32> -> vector<2x1xf32>
    %147 = vector.broadcast %146 : vector<2x1xf32> to vector<2x128xf32>
    %148 = arith.mulf %143, %147 : vector<2x128xf32>
    %c0_88 = arith.constant 0 : index
    %c0_89 = arith.constant 0 : index
    %149 = vector.load %arg11[%c0_88, %c0_89] : memref<2x128xf32, #tpu.memory_space<vmem>>, vector<2x128xf32>
    tpu.vector_store %arg11[%c0_88, %c0_89], %148 {strides = array<i32>} : memref<2x128xf32, #tpu.memory_space<vmem>>, vector<2x128xf32>,
    return
  }
}

</mosaic_0001>

<bundles_post_ra>
// kernel: tpu_custom_call.1
= control target key start
LH: loop header
LB: loop body
LE: loop exit
PB: predicated region body
PF: predicated region fallthrough
CT: control target
= control target key end

     0   :  { %16 = vsyncpa [#allocation3], 0  ;;  %s1595_s0 = inlined_call_operand.hbm [shape: f32[16,128], index: 0, kind: input, shape index: {}]   ;;  %s1596_s1 = inlined_call_operand.hbm [shape: f32[16,16], index: 1, kind: input, shape index: {}]   ;;  %s1597_s2 = inlined_call_operand.hbm [shape: f32[2,16], index: 2, kind: input, shape index: {}]   ;;  %s1598_s3 = inlined_call_operand.vmem [shape: f32[3,128,128], index: 3, kind: input, shape index: {}]   ;;  %s1599_s4 = inlined_call_operand.vmem [shape: f32[3,128,1], index: 4, kind: input, shape index: {}]   ;;  %s1600_s5 = inlined_call_operand.vmem [shape: f32[3,1,128], index: 5, kind: input, shape index: {}]   ;;  %s1601_s6 = inlined_call_operand.hbm [shape: f32[3,1,128], index: 6, kind: input, shape index: {}]   ;;  %s1602_s7 = inlined_call_operand.hbm [shape: f32[128,128], index: 7, kind: input, shape index: {}]   ;;  %s1603_s8 = inlined_call_operand.vmem [shape: f32[1,128], index: 8, kind: input, shape index: {}]   ;;  %s1604_s9 = inlined_call_operand.hbm [shape: f32[128,128], index: 9, kind: input, shape index: {}]   ;;  %s1605_s10 = inlined_call_operand.vmem [shape: f32[1,128], index: 10, kind: input, shape index: {}]   ;;  %s1606_s11 = inlined_call_operand.hbm [shape: f32[2,128], index: 11, kind: output, shape index: {}]  }
   0x1   :  { %17 = vsyncpa [#allocation6], 0 }
   0x2   :  { %18 = vsyncpa [#allocation9], 0 }
   0x3   :  { %19 = vsyncpa [#allocation12], 0 }
   0x4   :  { %20 = vsyncpa [#allocation4], 0  ;;  %s38_s19 = sshll.u32 %s1596_s1, 4  ;;  %s1138_s20 = smov [#allocation5]   ;;  %s39_s19 = int_to_ptr.hbm [resolvable:$true] %s38_s19 }
   0x5   :  { %s40_s21 = sshll.u32 %s1138_s20, 4  ;;  %s68_s24 = sshll.u32 %s1601_s6, 4  ;;  %s41_s21 = int_to_ptr.vmem [resolvable:$true] %s40_s21  ;;  %s69_s24 = int_to_ptr.hbm [resolvable:$true] %s68_s24 }
   0x6   :  { %s1139_s25 = smov 128   ;;  %s1140_s26 = smov 8  }
   0x7   :  { %46 = dma.hbm_to_vmem [thread:$0]  %s39_s19, 256, %s41_s21, [#allocation6], %s1139_s25, %s1139_s25, %s1140_s26  }
   0x8   :  { %s1141_s27 = smov [#allocation8]   ;;  %s1142_s29 = smov 16  }
   0x9   :  { %s70_s28 = sshll.u32 %s1141_s27, 4  ;;  %s1143_s1 = smov 1   ;;  %s71_s28 = int_to_ptr.vmem [resolvable:$true] %s70_s28 }
   0xa   :  { %76 = dma.hbm_to_vmem [thread:$0]  %s69_s24, 48, %s71_s28, [#allocation9], %s1142_s29, %s1142_s29, %s1143_s1  }
   0xb   :  { %s25_s13 = sshll.u32 %s1595_s0, 4  ;;  %s1144_s14 = smov [#allocation2]   ;;  %s26_s13 = int_to_ptr.hbm [resolvable:$true] %s25_s13 }
   0xc   :  { %s27_s6 = sshll.u32 %s1144_s14, 4  ;;  %s52_s17 = sshll.u32 %s1597_s2, 4  ;;  %s28_s6 = int_to_ptr.vmem [resolvable:$true] %s27_s6  ;;  %s53_s17 = int_to_ptr.hbm [resolvable:$true] %s52_s17 }
   0xd   :  { %33 = dma.hbm_to_vmem [thread:$0]  %s26_s13, 256, %s28_s6, [#allocation3], %s1139_s25, %s1139_s25, %s1140_s26  }
   0xe   :  { %s1145_s18 = smov [#allocation7]   ;;  %s81_s22 = sshll.u32 %s1602_s7, 4  ;;  %s82_s22 = int_to_ptr.hbm [resolvable:$true] %s81_s22 }
   0xf   :  { %s54_s19 = sshll.u32 %s1145_s18, 4  ;;  %s96_s24 = sshll.u32 %s1604_s9, 4  ;;  %s55_s19 = int_to_ptr.vmem [resolvable:$true] %s54_s19  ;;  %s97_s24 = int_to_ptr.hbm [resolvable:$true] %s96_s24 }
  0x10   :  { %57 = dma.hbm_to_vmem [thread:$0]  %s53_s17, 32, %s55_s19, [#allocation6]  }
  0x11   :  { %s1146_s27 = smov [#allocation10]   ;;  %s1147_s28 = smov [#allocation11]  }
  0x12   :  { %s83_s2 = sshll.u32 %s1146_s27, 4  ;;  %s98_s29 = sshll.u32 %s1147_s28, 4  ;;  %s84_s2 = int_to_ptr.vmem [resolvable:$true] %s83_s2  ;;  %s99_s29 = int_to_ptr.vmem [resolvable:$true] %s98_s29 }
  0x13   :  { %89 = dma.hbm_to_vmem [thread:$0]  %s82_s22, 2048, %s84_s2, [#allocation9], %s1139_s25, %s1139_s25, %s1140_s26  }
  0x14   :  { %104 = dma.hbm_to_vmem [thread:$0]  %s97_s24, 2048, %s99_s29, [#allocation12], %s1139_s25, %s1139_s25, %s1140_s26  }
  0x15   :  { %1128 = dma.done.wait [#allocation3], 256  }
  0x16   :  { %1129 = vsyncadd [#allocation3], 4294967040 }
  0x17   :  { %1130 = dma.done.wait [#allocation6], 288  }
  0x18   :  { %1131 = vsyncadd [#allocation6], 4294967008 }
  0x19   :  { %1132 = dma.done.wait [#allocation9], 2096  }
  0x1a   :  { %1133 = vsyncadd [#allocation9], 4294965200 }
  0x1b   :  { %1134 = dma.done.wait [#allocation12], 2048  }
  0x1c   :  { %1135 = vsyncadd [#allocation12], 4294965248  ;;  %v152_v0 = vld [vmem:[%s1598_s3 + $0x78] sm:$0xff]  ;;  %v151_v1 = vld [vmem:[%s1598_s3 + $0x70] sm:$0xff]  ;;  %v1148_v34 = vmov 0   ;;  %vm257_vm2 = vcmask 130048  }
  0x1d   :  { %153 = vmatpush.msra.mxu0 %v152_v0  ;;  %v150_v2 = vld [vmem:[%s1598_s3 + $0x68] sm:$0xff]  ;;  %v149_v3 = vld [vmem:[%s1598_s3 + $0x60] sm:$0xff]  ;;  %v148_v4 = vld [vmem:[%s1598_s3 + $0x58] sm:$0xff]  ;;  %924 = vset.pattern.permute.xlu0 %v1148_v34  ;;  %vm792_vm10 = vcmask 1041408   ;;  %s826_s7 = sshll.u32 %s1606_s11, 4  ;;  %s827_s7 = int_to_ptr.hbm [resolvable:$true] %s826_s7 }
  0x1e   :  { %v147_v5 = vld [vmem:[%s1598_s3 + $0x50] sm:$0xff]  ;;  %v191_v6 = vld [vmem:[%s1599_s4 + $0x78] sm:$0xff]  ;;  %v146_v8 = vld [vmem:[%s1598_s3 + $0x48] sm:$0xff]  ;;  %925 = vset.pattern.permute.xlu1 %v1148_v34  ;;  %926 = vset.pattern.permute.xlu2 %v1148_v34 }
  0x1f   :  { %154 = vmatpush.msra.mxu0 %v151_v1  ;;  %v190_v7 = vld [vmem:[%s1599_s4 + $0x70] sm:$0xff]  ;;  %192 = vmatpush.msra.mxu1 %v191_v6  ;;  %v189_v9 = vld [vmem:[%s1599_s4 + $0x68] sm:$0xff]  ;;  %v145_v10 = vld [vmem:[%s1598_s3 + $0x40] sm:$0xff] }
  0x20   :  { %v188_v11 = vld [vmem:[%s1599_s4 + $0x60] sm:$0xff]  ;;  %v144_v12 = vld [vmem:[%s1598_s3 + $0x38] sm:$0xff]  ;;  %v143_v14 = vld [vmem:[%s1598_s3 + $0x30] sm:$0xff] }
  0x21   :  { %155 = vmatpush.msra.mxu0 %v150_v2  ;;  %193 = vmatpush.msra.mxu1 %v190_v7  ;;  %v187_v13 = vld [vmem:[%s1599_s4 + $0x58] sm:$0xff]  ;;  %v186_v15 = vld [vmem:[%s1599_s4 + $0x50] sm:$0xff]  ;;  %v142_v16 = vld [vmem:[%s1598_s3 + $0x28] sm:$0xff] }
  0x22   :  { %v185_v17 = vld [vmem:[%s1599_s4 + $0x48] sm:$0xff]  ;;  %v141_v18 = vld [vmem:[%s1598_s3 + $0x20] sm:$0xff]  ;;  %v140_v20 = vld [vmem:[%s1598_s3 + $0x18] sm:$0xff] }
  0x23   :  { %156 = vmatpush.msra.mxu0 %v149_v3  ;;  %194 = vmatpush.msra.mxu1 %v189_v9  ;;  %v184_v19 = vld [vmem:[%s1599_s4 + $0x40] sm:$0xff]  ;;  %v183_v21 = vld [vmem:[%s1599_s4 + $0x38] sm:$0xff]  ;;  %v139_v22 = vld [vmem:[%s1598_s3 + $0x10] sm:$0xff] }
  0x24   :  { %v182_v23 = vld [vmem:[%s1599_s4 + $0x30] sm:$0xff]  ;;  %v138_v24 = vld [vmem:[%s1598_s3 + $0x8] sm:$0xff]  ;;  %v137_v26 = vld [vmem:[%s1598_s3] sm:$0xff] }
  0x25   :  { %157 = vmatpush.msra.mxu0 %v148_v4  ;;  %195 = vmatpush.msra.mxu1 %v188_v11  ;;  %v181_v25 = vld [vmem:[%s1599_s4 + $0x28] sm:$0xff]  ;;  %v180_v27 = vld [vmem:[%s1599_s4 + $0x20] sm:$0xff]  ;;  %v179_v29 = vld [vmem:[%s1599_s4 + $0x18] sm:$0xff] }
  0x26   :  { %v135_v28 = vld [vmem:[#allocation2] sm:$0xff]  ;;  %v178_v30 = vld [vmem:[%s1599_s4 + $0x10] sm:$0xff]  ;;  %v177_v31 = vld [vmem:[%s1599_s4 + $0x8] sm:$0xff] }
  0x27   :  { %158 = vmatpush.msra.mxu0 %v147_v5  ;;  %196 = vmatpush.msra.mxu1 %v187_v13  ;;  %v136_v32 = vld [vmem:[#allocation2 + $0x8] sm:$0xff]  ;;  %v176_v33 = vld [vmem:[%s1599_s4] sm:$0xff]  ;;  %v1339_v43 = vld [vmem:[#allocation5] sm:$0xff] }
  0x28   :  { %v215_v37 = vld [vmem:[%s1600_s5] sm:$0x1]  ;;  %vm133_vm0 = vcmp.gt.f32.partialorder %v1339_v43, 0.0  ;;  %v1345_v50 = vld [vmem:[#allocation5 + $0x8] sm:$0xff]  ;;  %v855_v5 = vld [vmem:[%s1598_s3 + $0xf0] sm:$0xff] }
  0x29   :  { %159 = vmatpush.msra.mxu0 %v146_v8  ;;  %197 = vmatpush.msra.mxu1 %v186_v15  ;;  %vm134_vm3 = vcmp.gt.f32.partialorder %v1345_v50, 0.0  ;;  %v856_v4 = vld [vmem:[%s1598_s3 + $0xf8] sm:$0xff]  ;;  %v854_v6 = vld [vmem:[%s1598_s3 + $0xe8] sm:$0xff]  ;;  %v853_v7 = vld [vmem:[%s1598_s3 + $0xe0] sm:$0xff] }
  0x2a   :  { %v852_v8 = vld [vmem:[%s1598_s3 + $0xd8] sm:$0xff]  ;;  %v851_v9 = vld [vmem:[%s1598_s3 + $0xd0] sm:$0xff]  ;;  %v849_v11 = vld [vmem:[%s1598_s3 + $0xc0] sm:$0xff] }
  0x2b   :  { %160 = vmatpush.msra.mxu0 %v145_v10  ;;  %198 = vmatpush.msra.mxu1 %v185_v17  ;;  %v850_v10 = vld [vmem:[%s1598_s3 + $0xc8] sm:$0xff]  ;;  %v848_v13 = vld [vmem:[%s1598_s3 + $0xb8] sm:$0xff] }
  0x2c   :  { %v846_v15 = vld [vmem:[%s1598_s3 + $0xa8] sm:$0xff]  ;;  %v864_v34 = vld [vmem:[%s1599_s4 + $0xb8] sm:$0xff] }
  0x2d   :  { %161 = vmatpush.msra.mxu0 %v144_v12  ;;  %199 = vmatpush.msra.mxu1 %v184_v19  ;;  %v720_v50 = vld [vmem:[#allocation10 + $0x68] sm:$0xff] }
  0x2f   :  { %162 = vmatpush.msra.mxu0 %v143_v14  ;;  %200 = vmatpush.msra.mxu1 %v183_v21  ;;  %v847_v14 = vld [vmem:[%s1598_s3 + $0xb0] sm:$0xff] }
  0x31   :  { %163 = vmatpush.msra.mxu0 %v142_v16  ;;  %201 = vmatpush.msra.mxu1 %v182_v23  ;;  %v845_v16 = vld [vmem:[%s1598_s3 + $0xa0] sm:$0xff]  ;;  %v843_v23 = vld [vmem:[%s1598_s3 + $0x90] sm:$0xff] }
  0x33   :  { %164 = vmatpush.msra.mxu0 %v141_v18  ;;  %202 = vmatpush.msra.mxu1 %v181_v25  ;;  %v841_v25 = vld [vmem:[%s1598_s3 + $0x80] sm:$0xff] }
  0x35   :  { %165 = vmatpush.msra.mxu0 %v140_v20  ;;  %203 = vmatpush.msra.mxu1 %v180_v27  ;;  %v844_v20 = vld [vmem:[%s1598_s3 + $0x98] sm:$0xff]  ;;  %v871_v27 = vld [vmem:[%s1599_s4 + $0xf0] sm:$0xff] }
  0x37   :  { %166 = vmatpush.msra.mxu0 %v139_v22  ;;  %204 = vmatpush.msra.mxu1 %v179_v29  ;;  %v869_v29 = vld [vmem:[%s1599_s4 + $0xe0] sm:$0xff] }
  0x39   :  { %167 = vmatpush.msra.mxu0 %v138_v24  ;;  %205 = vmatpush.msra.mxu1 %v178_v30  ;;  %v842_v24 = vld [vmem:[%s1598_s3 + $0x88] sm:$0xff]  ;;  %v868_v30 = vld [vmem:[%s1599_s4 + $0xd8] sm:$0xff] }
  0x3b   :  { %168 = vmatpush.msra.mxu0 %v137_v26  ;;  %206 = vmatpush.msra.mxu1 %v177_v31  ;;  %v872_v26 = vld [vmem:[%s1599_s4 + $0xf8] sm:$0xff]  ;;  %v867_v31 = vld [vmem:[%s1599_s4 + $0xd0] sm:$0xff] }
  0x3c   :  { %169 = vmatmul.f32.vlgmr.msra.gmra.mxu0 %v135_v28  ;;  %v870_v28 = vld [vmem:[%s1599_s4 + $0xe8] sm:$0xff] }
  0x3d   :  { %207 = vmatpush.msra.mxu1 %v176_v33  ;;  %v865_v33 = vld [vmem:[%s1599_s4 + $0xc0] sm:$0xff] }
  0x44   :  { %172 = vmatmul.f32.gmra.mxu0 %v136_v32  ;;  %v866_v32 = vld [vmem:[%s1599_s4 + $0xc8] sm:$0xff] }
  0xb9   :  { %v170_v35 = vpop.f32.mrf.mxu0 }
  0xba   :  { %208 = vmatmul.f32.vlgmr.msra.gmra.mxu1 %v170_v35 }
  0xc1   :  { %v173_v36 = vpop.f32.mrf.mxu0 }
  0xc2   :  { %211 = vmatmul.f32.gmra.mxu1 %v173_v36  ;;  %230 = vmatpush.xpose.msra.mxu2 %v173_v36 }
  0xc3   :  { %306 = vmatpush.msra.mxu3 %v173_v36  ;;  %v863_v36 = vld [vmem:[%s1599_s4 + $0xb0] sm:$0xff] }
  0xc5   :  { %307 = vmatpush.msra.mxu3 %v170_v35 }
  0xc6   :  { %231 = vmatpush.xpose.msra.mxu2 %v170_v35  ;;  %v927_v35 = vld [vmem:[#allocation8] ss:$0 sm:$0xff] }
  0xc7   :  { %334 = vmatpush.msrb.mxu3 %v856_v4 }
  0xc9   :  { %232 = vmatmul.f32.vlgmr.msra.gmra.mxu2 %v215_v37  ;;  %335 = vmatpush.msrb.mxu3 %v855_v5  ;;  %v862_v37 = vld [vmem:[%s1599_s4 + $0xa8] sm:$0xff] }
  0xca   :  { %374 = vmatpush.msrb.mxu2 %v872_v26 }
  0xcb   :  { %336 = vmatpush.msrb.mxu3 %v854_v6 }
  0xcc   :  { %375 = vmatpush.msrb.mxu2 %v871_v27  ;;  %v883_v27 = vld [vmem:[%s1598_s3 + $0x138] sm:$0xff] }
  0xcd   :  { %337 = vmatpush.msrb.mxu3 %v853_v7 }
  0xce   :  { %376 = vmatpush.msrb.mxu2 %v870_v28  ;;  %v882_v28 = vld [vmem:[%s1598_s3 + $0x130] sm:$0xff] }
  0xcf   :  { %338 = vmatpush.msrb.mxu3 %v852_v8 }
  0xd0   :  { %377 = vmatpush.msrb.mxu2 %v869_v29  ;;  %v881_v29 = vld [vmem:[%s1598_s3 + $0x128] sm:$0xff] }
  0xd1   :  { %339 = vmatpush.msrb.mxu3 %v851_v9 }
  0xd2   :  { %378 = vmatpush.msrb.mxu2 %v868_v30  ;;  %v880_v30 = vld [vmem:[%s1598_s3 + $0x120] sm:$0xff] }
  0xd3   :  { %340 = vmatpush.msrb.mxu3 %v850_v10 }
  0xd4   :  { %379 = vmatpush.msrb.mxu2 %v867_v31 }
  0xd5   :  { %341 = vmatpush.msrb.mxu3 %v849_v11 }
  0xd6   :  { %380 = vmatpush.msrb.mxu2 %v866_v32 }
  0xd7   :  { %342 = vmatpush.msrb.mxu3 %v848_v13 }
  0xd8   :  { %381 = vmatpush.msrb.mxu2 %v865_v33 }
  0xd9   :  { %343 = vmatpush.msrb.mxu3 %v847_v14 }
  0xda   :  { %382 = vmatpush.msrb.mxu2 %v864_v34  ;;  %v879_v34 = vld [vmem:[%s1598_s3 + $0x118] sm:$0xff] }
  0xdb   :  { %344 = vmatpush.msrb.mxu3 %v846_v15 }
  0xdc   :  { %383 = vmatpush.msrb.mxu2 %v863_v36 }
  0xdd   :  { %345 = vmatpush.msrb.mxu3 %v845_v16 }
  0xde   :  { %384 = vmatpush.msrb.mxu2 %v862_v37  ;;  %v878_v37 = vld [vmem:[%s1598_s3 + $0x110] sm:$0xff] }
  0xdf   :  { %346 = vmatpush.msrb.mxu3 %v844_v20  ;;  %v889_v20 = vld [vmem:[%s1598_s3 + $0x168] sm:$0xff] }
  0xe1   :  { %347 = vmatpush.msrb.mxu3 %v843_v23  ;;  %v886_v23 = vld [vmem:[%s1598_s3 + $0x150] sm:$0xff] }
  0xe3   :  { %348 = vmatpush.msrb.mxu3 %v842_v24  ;;  %v885_v24 = vld [vmem:[%s1598_s3 + $0x148] sm:$0xff] }
  0xe5   :  { %349 = vmatpush.msrb.mxu3 %v841_v25  ;;  %v884_v25 = vld [vmem:[%s1598_s3 + $0x140] sm:$0xff] }
 0x137   :  { %v209_v38 = vpop.f32.mrf.mxu1 }
 0x138   :  { %238 = vperm.xlu0 %924, %v209_v38  }
 0x13f   :  { %v212_v39 = vpop.f32.mrf.mxu1 }
 0x140   :  { %243 = vperm.xlu0 %924, %v212_v39  }
 0x14c   :  { %v233_v40 = vpop.f32.mrf.mxu2 }
 0x14d   :  { %v246_v41 = vperm.slane %v233_v40, 0  ;;  %v861_v40 = vld [vmem:[%s1599_s4 + $0xa0] sm:$0xff] }
 0x14e   :  { %385 = vmatpush.msrb.mxu2 %v861_v40  ;;  %v907_v40 = vld [vmem:[%s1599_s4 + $0x178] sm:$0xff] }
 0x1aa   :  { %v239_v42 = vpop.permute.xlu0 %238 }
 0x1ab   :  { %v247_v44 = vadd.f32 %v246_v41, %v239_v42  ;;  %v860_v42 = vld [vmem:[%s1599_s4 + $0x98] sm:$0xff] }
 0x1ac   :  { %386 = vmatpush.msrb.mxu2 %v860_v42  ;;  %v905_v42 = vld [vmem:[%s1599_s4 + $0x168] sm:$0xff] }
 0x1ad   :  { %v251_v45 = vmul.f32 0.2, %v247_v44  ;;  %vm249_vm1 = vcmp.gt.f32.partialorder %v247_v44, 0.0 }
 0x1af   :  { %v253_v46 = vsel %vm249_vm1, %v247_v44, %v251_v45  ;;  %v859_v44 = vld [vmem:[%s1599_s4 + $0x90] sm:$0xff]  ;;  %v858_v45 = vld [vmem:[%s1599_s4 + $0x88] sm:$0xff] }
 0x1b0   :  { %v255_v47 = vsel %vm133_vm0, %v253_v46, -1e+30  ;;  %387 = vmatpush.msrb.mxu2 %v859_v44  ;;  %v904_v44 = vld [vmem:[%s1599_s4 + $0x160] sm:$0xff] }
 0x1b1   :  { %v258_v48 = vsel %vm257_vm2, %v255_v47, -inf }
 0x1b2   :  { %v244_v49 = vpop.permute.xlu0 %243  ;;  %259 = vmax.xlane.f32.xlu1 %v258_v48  ;;  %388 = vmatpush.msrb.mxu2 %v858_v45  ;;  %v903_v45 = vld [vmem:[%s1599_s4 + $0x158] sm:$0xff] }
 0x1b3   :  { %v248_v51 = vadd.f32 %v246_v41, %v244_v49  ;;  %v857_v49 = vld [vmem:[%s1599_s4 + $0x80] sm:$0xff] }
 0x1b4   :  { %389 = vmatpush.msrb.mxu2 %v857_v49  ;;  %v899_v49 = vld [vmem:[%s1599_s4 + $0x138] sm:$0xff] }
 0x1b5   :  { %v252_v52 = vmul.f32 0.2, %v248_v51  ;;  %vm250_vm4 = vcmp.gt.f32.partialorder %v248_v51, 0.0 }
 0x1b6   :  { %557 = vmatpush.msra.mxu2 %v907_v40  ;;  %v718_v40 = vld [vmem:[#allocation10 + $0x58] sm:$0xff] }
 0x1b7   :  { %v254_v53 = vsel %vm250_vm4, %v248_v51, %v252_v52 }
 0x1b8   :  { %v256_v54 = vsel %vm134_vm3, %v254_v53, -1e+30  ;;  %v873_v53 = vld [vmem:[%s1600_s5 + $0x1] sm:$0x1] }
 0x1b9   :  { %v261_v55 = vsel %vm257_vm2, %v256_v54, -inf }
 0x1ba   :  { %262 = vmax.xlane.f32.xlu1 %v261_v55 }
 0x225   :  { %v260_v56 = vpop.xlane.xlu1 %259 }
 0x226   :  { %v264_v57 = vsub.f32 %v255_v47, %v260_v56 }
 0x228   :  { %v266_v58 = vmul.f32 1.442695, %v264_v57 }
 0x22a   :  { %932 = vpow2.f32 %v266_v58 }
 0x22d   :  { %v263_v59 = vpop.xlane.xlu1 %262 }
 0x22e   :  { %v265_v60 = vsub.f32 %v256_v54, %v263_v59 }
 0x230   :  { %v933_v61 = vpop.eup %932  ;;  %v268_v62 = vmul.f32 1.442695, %v265_v60 }
 0x231   :  { %v270_v63 = vsel %vm133_vm0, %v933_v61, 0.0 }
 0x232   :  { %934 = vpow2.f32 %v268_v62  ;;  %v272_v0 = vsel %vm257_vm2, %v270_v63, 0.0 }
 0x233   :  { %273 = vadd.xlane.f32.xlu2 %v272_v0 }
 0x238   :  { %v935_v1 = vpop.eup %934 }
 0x239   :  { %v271_v2 = vsel %vm134_vm3, %v935_v1, 0.0 }
 0x23a   :  { %v275_v3 = vsel %vm257_vm2, %v271_v2, 0.0 }
 0x23b   :  { %276 = vadd.xlane.f32.xlu2 %v275_v3 }
 0x2a6   :  { %v274_v12 = vpop.xlane.xlu2 %273 }
 0x2a7   :  { %936 = vrcp.f32 %v274_v12 }
 0x2ad   :  { %v937_v17 = vpop.eup %936 }
 0x2ae   :  { %v277_v18 = vpop.xlane.xlu2 %276  ;;  %v280_v19 = vmul.f32 %v937_v17, %v270_v63 }
 0x2af   :  { %938 = vrcp.f32 %v277_v18  ;;  %v891_v18 = vld [vmem:[%s1598_s3 + $0x178] sm:$0xff] }
 0x2b0   :  { %839 = vmatmul.msk.f32.vlgmr.msra.gmra.mxu3 %vm257_vm2, %v280_v19  ;;  %v890_v19 = vld [vmem:[%s1598_s3 + $0x170] sm:$0xff] }
 0x2b1   :  { %517 = vmatpush.msra.mxu3 %v891_v18 }
 0x2b3   :  { %518 = vmatpush.msra.mxu3 %v890_v19 }
 0x2b5   :  { %v939_v21 = vpop.eup %938  ;;  %519 = vmatpush.msra.mxu3 %v889_v20 }
 0x2b6   :  { %v281_v22 = vmul.f32 %v939_v21, %v271_v2  ;;  %v888_v21 = vld [vmem:[%s1598_s3 + $0x160] sm:$0xff] }
 0x2b7   :  { %520 = vmatpush.msra.mxu3 %v888_v21 }
 0x2b8   :  { %840 = vmatmul.msk.f32.gmra.mxu3 %vm257_vm2, %v281_v22  ;;  %v887_v22 = vld [vmem:[%s1598_s3 + $0x158] sm:$0xff] }
 0x2b9   :  { %521 = vmatpush.msra.mxu3 %v887_v22 }
 0x2bb   :  { %522 = vmatpush.msra.mxu3 %v886_v23 }
 0x2bd   :  { %523 = vmatpush.msra.mxu3 %v885_v24 }
 0x2bf   :  { %524 = vmatpush.msra.mxu3 %v884_v25 }
 0x2c1   :  { %525 = vmatpush.msra.mxu3 %v883_v27 }
 0x2c3   :  { %526 = vmatpush.msra.mxu3 %v882_v28 }
 0x2c5   :  { %527 = vmatpush.msra.mxu3 %v881_v29 }
 0x2c7   :  { %528 = vmatpush.msra.mxu3 %v880_v30 }
 0x2c9   :  { %529 = vmatpush.msra.mxu3 %v879_v34 }
 0x2cb   :  { %530 = vmatpush.msra.mxu3 %v878_v37  ;;  %v722_v37 = vld [vmem:[#allocation10 + $0x78] sm:$0xff] }
 0x333   :  { %v309_v38 = vpop.f32.mrf.mxu3 }
 0x334   :  { %v310_v39 = vadd.f32 %v927_v35, %v309_v38  ;;  %v877_v38 = vld [vmem:[%s1598_s3 + $0x108] sm:$0xff] }
 0x335   :  { %531 = vmatpush.msra.mxu3 %v877_v38  ;;  %v721_v38 = vld [vmem:[#allocation10 + $0x70] sm:$0xff] }
 0x336   :  { %v315_v41 = vmax.f32 %v310_v39, 0.0  ;;  %v876_v39 = vld [vmem:[%s1598_s3 + $0x100] sm:$0xff] }
 0x337   :  { %532 = vmatpush.msra.mxu3 %v876_v39  ;;  %v719_v39 = vld [vmem:[#allocation10 + $0x60] sm:$0xff] }
 0x338   :  { %350 = vmatmul.f32.vlgmr.msrb.gmra.mxu3 %v315_v41  ;;  %v906_v41 = vld [vmem:[%s1599_s4 + $0x170] sm:$0xff] }
 0x339   :  { %558 = vmatpush.msra.mxu2 %v906_v41  ;;  %v717_v41 = vld [vmem:[#allocation10 + $0x50] sm:$0xff] }
 0x33b   :  { %v312_v46 = vpop.f32.mrf.mxu3  ;;  %559 = vmatpush.msra.mxu2 %v905_v42  ;;  %v716_v42 = vld [vmem:[#allocation10 + $0x48] sm:$0xff] }
 0x33c   :  { %v313_v47 = vadd.f32 %v927_v35, %v312_v46  ;;  %v902_v46 = vld [vmem:[%s1599_s4 + $0x150] sm:$0xff] }
 0x33d   :  { %560 = vmatpush.msra.mxu2 %v904_v44  ;;  %v715_v44 = vld [vmem:[#allocation10 + $0x40] sm:$0xff] }
 0x33e   :  { %v316_v48 = vmax.f32 %v313_v47, 0.0  ;;  %v901_v47 = vld [vmem:[%s1599_s4 + $0x148] sm:$0xff] }
 0x33f   :  { %561 = vmatpush.msra.mxu2 %v903_v45  ;;  %v714_v45 = vld [vmem:[#allocation10 + $0x38] sm:$0xff] }
 0x340   :  { %353 = vmatmul.f32.gmra.mxu3 %v316_v48  ;;  %v900_v48 = vld [vmem:[%s1599_s4 + $0x140] sm:$0xff] }
 0x341   :  { %562 = vmatpush.msra.mxu2 %v902_v46 }
 0x343   :  { %563 = vmatpush.msra.mxu2 %v901_v47  ;;  %v713_v47 = vld [vmem:[#allocation10 + $0x30] sm:$0xff] }
 0x345   :  { %564 = vmatpush.msra.mxu2 %v900_v48  ;;  %v712_v48 = vld [vmem:[#allocation10 + $0x28] sm:$0xff] }
 0x347   :  { %565 = vmatpush.msra.mxu2 %v899_v49  ;;  %v711_v49 = vld [vmem:[#allocation10 + $0x20] sm:$0xff] }
 0x3bb   :  { %v351_v51 = vpop.f32.mrf.mxu3 }
 0x3bc   :  { %390 = vmatmul.f32.vlgmr.msrb.gmra.mxu2 %v351_v51 }
 0x3c3   :  { %v354_v52 = vpop.f32.mrf.mxu3 }
 0x3c4   :  { %393 = vmatmul.f32.gmra.mxu2 %v354_v52  ;;  %413 = vmatpush.xpose.msrb.mxu0 %v354_v52 }
 0x3c5   :  { %489 = vmatpush.msrb.mxu1 %v354_v52  ;;  %v898_v52 = vld [vmem:[%s1599_s4 + $0x130] sm:$0xff] }
 0x3c6   :  { %566 = vmatpush.msra.mxu2 %v898_v52  ;;  %v710_v52 = vld [vmem:[#allocation10 + $0x18] sm:$0xff] }
 0x3c7   :  { %490 = vmatpush.msrb.mxu1 %v351_v51 }
 0x3c8   :  { %414 = vmatpush.xpose.msrb.mxu0 %v351_v51  ;;  %v928_v51 = vld [vmem:[#allocation8 + $0x1] ss:$0 sm:$0xff] }
 0x3cb   :  { %415 = vmatmul.f32.vlgmr.msrb.gmra.mxu0 %v873_v53  ;;  %v897_v53 = vld [vmem:[%s1599_s4 + $0x128] sm:$0xff] }
 0x3cc   :  { %567 = vmatpush.msra.mxu2 %v897_v53 }
 0x43f   :  { %v391_v54 = vpop.f32.mrf.mxu2 }
 0x440   :  { %421 = vperm.xlu0 %924, %v391_v54  }
 0x447   :  { %v394_v55 = vpop.f32.mrf.mxu2 }
 0x448   :  { %426 = vperm.xlu1 %925, %v394_v55   ;;  %v416_v56 = vpop.f32.mrf.mxu0 }
 0x449   :  { %v429_v57 = vperm.slane %v416_v56, 0  ;;  %v896_v56 = vld [vmem:[%s1599_s4 + $0x120] sm:$0xff] }
 0x44a   :  { %568 = vmatpush.msra.mxu2 %v896_v56 }
 0x4b2   :  { %v422_v58 = vpop.permute.xlu0 %421 }
 0x4b3   :  { %v430_v59 = vadd.f32 %v429_v57, %v422_v58  ;;  %v895_v58 = vld [vmem:[%s1599_s4 + $0x118] sm:$0xff] }
 0x4b4   :  { %569 = vmatpush.msra.mxu2 %v895_v58 }
 0x4b5   :  { %v434_v60 = vmul.f32 0.2, %v430_v59  ;;  %vm432_vm5 = vcmp.gt.f32.partialorder %v430_v59, 0.0 }
 0x4b7   :  { %v436_v61 = vsel %vm432_vm5, %v430_v59, %v434_v60  ;;  %v894_v59 = vld [vmem:[%s1599_s4 + $0x110] sm:$0xff]  ;;  %v893_v60 = vld [vmem:[%s1599_s4 + $0x108] sm:$0xff] }
 0x4b8   :  { %v438_v62 = vsel %vm133_vm0, %v436_v61, -1e+30  ;;  %570 = vmatpush.msra.mxu2 %v894_v59 }
 0x4b9   :  { %v440_v63 = vsel %vm257_vm2, %v438_v62, -inf }
 0x4ba   :  { %441 = vmax.xlane.f32.xlu2 %v440_v63  ;;  %v427_v0 = vpop.permute.xlu1 %426  ;;  %571 = vmatpush.msra.mxu2 %v893_v60  ;;  %v683_v60 = vld [vmem:[#allocation7] sm:$0x3] }
 0x4bb   :  { %v431_v1 = vadd.f32 %v429_v57, %v427_v0  ;;  %v892_v0 = vld [vmem:[%s1599_s4 + $0x100] sm:$0xff] }
 0x4bc   :  { %572 = vmatpush.msra.mxu2 %v892_v0  ;;  %v761_v0 = vld [vmem:[#allocation11 + $0x68] sm:$0xff] }
 0x4bd   :  { %v435_v2 = vmul.f32 0.2, %v431_v1  ;;  %vm433_vm6 = vcmp.gt.f32.partialorder %v431_v1, 0.0 }
 0x4bf   :  { %v437_v3 = vsel %vm433_vm6, %v431_v1, %v435_v2 }
 0x4c0   :  { %v439_v4 = vsel %vm134_vm3, %v437_v3, -1e+30  ;;  %v908_v3 = vld [vmem:[%s1600_s5 + $0x2] sm:$0x1] }
 0x4c1   :  { %v443_v5 = vsel %vm257_vm2, %v439_v4, -inf }
 0x4c2   :  { %444 = vmax.xlane.f32.xlu0 %v443_v5 }
 0x52d   :  { %v442_v6 = vpop.xlane.xlu2 %441 }
 0x52e   :  { %v446_v7 = vsub.f32 %v438_v62, %v442_v6 }
 0x530   :  { %v448_v8 = vmul.f32 1.442695, %v446_v7 }
 0x532   :  { %940 = vpow2.f32 %v448_v8 }
 0x535   :  { %v445_v9 = vpop.xlane.xlu0 %444 }
 0x536   :  { %v447_v10 = vsub.f32 %v439_v4, %v445_v9 }
 0x538   :  { %v941_v11 = vpop.eup %940  ;;  %v450_v12 = vmul.f32 1.442695, %v447_v10 }
 0x539   :  { %v452_v13 = vsel %vm133_vm0, %v941_v11, 0.0 }
 0x53a   :  { %942 = vpow2.f32 %v450_v12  ;;  %v454_v14 = vsel %vm257_vm2, %v452_v13, 0.0 }
 0x53b   :  { %455 = vadd.xlane.f32.xlu2 %v454_v14 }
 0x540   :  { %v943_v15 = vpop.eup %942 }
 0x541   :  { %v453_v16 = vsel %vm134_vm3, %v943_v15, 0.0 }
 0x542   :  { %v457_v17 = vsel %vm257_vm2, %v453_v16, 0.0 }
 0x543   :  { %458 = vadd.xlane.f32.xlu2 %v457_v17 }
 0x5ae   :  { %v456_v26 = vpop.xlane.xlu2 %455 }
 0x5af   :  { %944 = vrcp.f32 %v456_v26 }
 0x5b5   :  { %v945_v31 = vpop.eup %944 }
 0x5b6   :  { %v459_v32 = vpop.xlane.xlu2 %458  ;;  %v462_v33 = vmul.f32 %v945_v31, %v452_v13 }
 0x5b7   :  { %946 = vrcp.f32 %v459_v32 }
 0x5b8   :  { %874 = vmatmul.msk.f32.vlgmr.msrb.gmra.mxu1 %vm257_vm2, %v462_v33 }
 0x5bd   :  { %v947_v35 = vpop.eup %946 }
 0x5be   :  { %v463_v36 = vmul.f32 %v947_v35, %v453_v16 }
 0x5c0   :  { %875 = vmatmul.msk.f32.gmra.mxu1 %vm257_vm2, %v463_v36 }
 0x635   :  { %v492_v54 = vpop.f32.mrf.mxu1 }
 0x636   :  { %v493_v55 = vadd.f32 %v928_v51, %v492_v54  ;;  %v709_v54 = vld [vmem:[#allocation10 + $0x10] sm:$0xff] }
 0x638   :  { %v498_v57 = vmax.f32 %v493_v55, 0.0 }
 0x63a   :  { %533 = vmatmul.f32.vlgmr.msra.gmra.mxu3 %v498_v57  ;;  %v708_v57 = vld [vmem:[#allocation10 + $0x8] sm:$0xff] }
 0x63d   :  { %v495_v61 = vpop.f32.mrf.mxu1 }
 0x63e   :  { %v496_v62 = vadd.f32 %v928_v51, %v495_v61  ;;  %v929_v51 = vld [vmem:[#allocation8 + $0x2] ss:$0 sm:$0xff]  ;;  %v707_v61 = vld [vmem:[#allocation10] sm:$0xff] }
 0x640   :  { %v499_v63 = vmax.f32 %v496_v62, 0.0  ;;  %v763_v62 = vld [vmem:[#allocation11 + $0x78] sm:$0xff] }
 0x641   :  { %768 = vmatpush.msra.mxu1 %v763_v62 }
 0x642   :  { %536 = vmatmul.f32.gmra.mxu3 %v499_v63  ;;  %v762_v63 = vld [vmem:[#allocation11 + $0x70] sm:$0xff] }
 0x643   :  { %769 = vmatpush.msra.mxu1 %v762_v63 }
 0x645   :  { %770 = vmatpush.msra.mxu1 %v761_v0 }
 0x6bd   :  { %v534_v1 = vpop.f32.mrf.mxu3 }
 0x6be   :  { %573 = vmatmul.f32.vlgmr.msra.gmra.mxu2 %v534_v1 }
 0x6c5   :  { %v537_v2 = vpop.f32.mrf.mxu3 }
 0x6c6   :  { %576 = vmatmul.f32.gmra.mxu2 %v537_v2  ;;  %596 = vmatpush.xpose.msrb.mxu3 %v537_v2 }
 0x6c7   :  { %672 = vmatpush.msra.mxu0 %v537_v2  ;;  %v759_v2 = vld [vmem:[#allocation11 + $0x58] sm:$0xff] }
 0x6c9   :  { %673 = vmatpush.msra.mxu0 %v534_v1 }
 0x6ca   :  { %597 = vmatpush.xpose.msrb.mxu3 %v534_v1  ;;  %v760_v1 = vld [vmem:[#allocation11 + $0x60] sm:$0xff] }
 0x6cb   :  { %727 = vmatpush.msrb.mxu0 %v722_v37  ;;  %771 = vmatpush.msra.mxu1 %v760_v1 }
 0x6cd   :  { %598 = vmatmul.f32.vlgmr.msrb.gmra.mxu3 %v908_v3  ;;  %728 = vmatpush.msrb.mxu0 %v721_v38  ;;  %v758_v3 = vld [vmem:[#allocation11 + $0x50] sm:$0xff] }
 0x6ce   :  { %772 = vmatpush.msra.mxu1 %v759_v2 }
 0x6cf   :  { %729 = vmatpush.msrb.mxu0 %v720_v50 }
 0x6d0   :  { %773 = vmatpush.msra.mxu1 %v758_v3 }
 0x6d1   :  { %730 = vmatpush.msrb.mxu0 %v719_v39 }
 0x6d3   :  { %731 = vmatpush.msrb.mxu0 %v718_v40 }
 0x6d5   :  { %732 = vmatpush.msrb.mxu0 %v717_v41 }
 0x6d7   :  { %733 = vmatpush.msrb.mxu0 %v716_v42 }
 0x6d9   :  { %734 = vmatpush.msrb.mxu0 %v715_v44 }
 0x6db   :  { %735 = vmatpush.msrb.mxu0 %v714_v45 }
 0x6dd   :  { %736 = vmatpush.msrb.mxu0 %v713_v47 }
 0x6df   :  { %737 = vmatpush.msrb.mxu0 %v712_v48 }
 0x6e1   :  { %738 = vmatpush.msrb.mxu0 %v711_v49 }
 0x6e3   :  { %739 = vmatpush.msrb.mxu0 %v710_v52 }
 0x6e5   :  { %740 = vmatpush.msrb.mxu0 %v709_v54 }
 0x6e7   :  { %741 = vmatpush.msrb.mxu0 %v708_v57 }
 0x6e9   :  { %742 = vmatpush.msrb.mxu0 %v707_v61 }
 0x741   :  { %v574_v4 = vpop.f32.mrf.mxu2 }
 0x742   :  { %604 = vperm.xlu2 %926, %v574_v4   ;;  %v757_v4 = vld [vmem:[#allocation11 + $0x48] sm:$0xff] }
 0x743   :  { %774 = vmatpush.msra.mxu1 %v757_v4 }
 0x749   :  { %v577_v5 = vpop.f32.mrf.mxu2 }
 0x74a   :  { %609 = vperm.xlu1 %925, %v577_v5   ;;  %v756_v5 = vld [vmem:[#allocation11 + $0x40] sm:$0xff] }
 0x74b   :  { %775 = vmatpush.msra.mxu1 %v756_v5 }
 0x750   :  { %v599_v6 = vpop.f32.mrf.mxu3 }
 0x751   :  { %v612_v7 = vperm.slane %v599_v6, 0  ;;  %v755_v6 = vld [vmem:[#allocation11 + $0x38] sm:$0xff] }
 0x752   :  { %776 = vmatpush.msra.mxu1 %v755_v6 }
 0x79c   :  { %v605_v8 = vpop.permute.xlu2 %604 }
 0x79d   :  { %v613_v9 = vadd.f32 %v612_v7, %v605_v8  ;;  %v753_v8 = vld [vmem:[#allocation11 + $0x28] sm:$0xff] }
 0x79f   :  { %v617_v10 = vmul.f32 0.2, %v613_v9  ;;  %vm615_vm7 = vcmp.gt.f32.partialorder %v613_v9, 0.0 }
 0x7a1   :  { %v619_v11 = vsel %vm615_vm7, %v613_v9, %v617_v10  ;;  %v752_v9 = vld [vmem:[#allocation11 + $0x20] sm:$0xff]  ;;  %v751_v10 = vld [vmem:[#allocation11 + $0x18] sm:$0xff] }
 0x7a2   :  { %v621_v12 = vsel %vm133_vm0, %v619_v11, -1e+30 }
 0x7a3   :  { %v623_v13 = vsel %vm257_vm2, %v621_v12, -inf }
 0x7a4   :  { %624 = vmax.xlane.f32.xlu1 %v623_v13  ;;  %v749_v13 = vld [vmem:[#allocation11 + $0x8] sm:$0xff] }
 0x7bc   :  { %v610_v14 = vpop.permute.xlu1 %609 }
 0x7bd   :  { %v614_v15 = vadd.f32 %v612_v7, %v610_v14  ;;  %v754_v7 = vld [vmem:[#allocation11 + $0x30] sm:$0xff]  ;;  %v748_v14 = vld [vmem:[#allocation11] sm:$0xff] }
 0x7be   :  { %777 = vmatpush.msra.mxu1 %v754_v7 }
 0x7bf   :  { %v618_v16 = vmul.f32 0.2, %v614_v15  ;;  %vm616_vm8 = vcmp.gt.f32.partialorder %v614_v15, 0.0 }
 0x7c0   :  { %778 = vmatpush.msra.mxu1 %v753_v8 }
 0x7c1   :  { %v620_v17 = vsel %vm616_vm8, %v614_v15, %v618_v16  ;;  %v930_v15 = vld [vmem:[%s1603_s8] ss:$0 sm:$0xff]  ;;  %s1149_s8 = smov [#allocation13]  }
 0x7c2   :  { %v622_v18 = vsel %vm134_vm3, %v620_v17, -1e+30  ;;  %779 = vmatpush.msra.mxu1 %v752_v9 }
 0x7c3   :  { %v626_v19 = vsel %vm257_vm2, %v622_v18, -inf }
 0x7c4   :  { %627 = vmax.xlane.f32.xlu2 %v626_v19  ;;  %780 = vmatpush.msra.mxu1 %v751_v10  ;;  %v788_v19 = vlaneseq }
 0x817   :  { %v625_v20 = vpop.xlane.xlu1 %624 }
 0x818   :  { %v629_v21 = vsub.f32 %v621_v12, %v625_v20  ;;  %v750_v12 = vld [vmem:[#allocation11 + $0x10] sm:$0xff]  ;;  %v789_v20 = vand.u32 127, %v788_v19 }
 0x819   :  { %781 = vmatpush.msra.mxu1 %v750_v12 }
 0x81a   :  { %v631_v22 = vmul.f32 1.442695, %v629_v21  ;;  %v931_v21 = vld [vmem:[%s1605_s10] ss:$0 sm:$0xff]  ;;  %vm790_vm9 = vcmp.lt.s32.totalorder %v789_v20, 4  ;;  %s824_s10 = sshll.u32 %s1149_s8, 4  ;;  %s825_s10 = int_to_ptr.vmem [resolvable:$true] %s824_s10 }
 0x81b   :  { %782 = vmatpush.msra.mxu1 %v749_v13 }
 0x81c   :  { %948 = vpow2.f32 %v631_v22 }
 0x81d   :  { %783 = vmatpush.msra.mxu1 %v748_v14 }
 0x822   :  { %v949_v23 = vpop.eup %948 }
 0x823   :  { %v635_v24 = vsel %vm133_vm0, %v949_v23, 0.0 }
 0x824   :  { %v637_v25 = vsel %vm257_vm2, %v635_v24, 0.0 }
 0x825   :  { %638 = vadd.xlane.f32.xlu0 %v637_v25 }
 0x837   :  { %v628_v26 = vpop.xlane.xlu2 %627 }
 0x838   :  { %v630_v27 = vsub.f32 %v622_v18, %v628_v26 }
 0x83a   :  { %v633_v28 = vmul.f32 1.442695, %v630_v27 }
 0x83c   :  { %950 = vpow2.f32 %v633_v28 }
 0x842   :  { %v951_v29 = vpop.eup %950 }
 0x843   :  { %v636_v30 = vsel %vm134_vm3, %v951_v29, 0.0 }
 0x844   :  { %v640_v31 = vsel %vm257_vm2, %v636_v30, 0.0 }
 0x845   :  { %641 = vadd.xlane.f32.xlu0 %v640_v31 }
 0x898   :  { %v639_v32 = vpop.xlane.xlu0 %638 }
 0x899   :  { %952 = vrcp.f32 %v639_v32 }
 0x89f   :  { %v953_v33 = vpop.eup %952 }
 0x8a0   :  { %v645_v34 = vmul.f32 %v953_v33, %v635_v24 }
 0x8a2   :  { %909 = vmatmul.msk.f32.vlgmr.msra.gmra.mxu0 %vm257_vm2, %v645_v34 }
 0x8b8   :  { %v642_v43 = vpop.xlane.xlu0 %641 }
 0x8b9   :  { %954 = vrcp.f32 %v642_v43 }
 0x8bf   :  { %v955_v35 = vpop.eup %954 }
 0x8c0   :  { %v646_v36 = vmul.f32 %v955_v35, %v636_v30 }
 0x8c2   :  { %910 = vmatmul.msk.f32.gmra.mxu0 %vm257_vm2, %v646_v36 }
 0x91f   :  { %v675_v46 = vpop.f32.mrf.mxu0 }
 0x920   :  { %v676_v55 = vadd.f32 %v929_v51, %v675_v46 }
 0x922   :  { %v681_v59 = vmax.f32 %v676_v55, 0.0 }
 0x93f   :  { %v678_v53 = vpop.f32.mrf.mxu0 }
 0x940   :  { %v679_v56 = vadd.f32 %v929_v51, %v678_v53 }
 0x942   :  { %v682_v58 = vmax.f32 %v679_v56, 0.0 }
 0x944   :  { %701 = vmatpush.msrb.mxu2 %v682_v58 }
 0x946   :  { %702 = vmatpush.msrb.mxu2 %v681_v59 }
 0x947   :  { %911 = vmatmul.msk.f32.vlgmr.msrb.gmra.mxu2 %vm257_vm2, %v683_v60 }
 0x9ca   :  { %v704_v11 = vpop.f32.mrf.mxu2 }
 0x9cb   :  { %743 = vmatmul.f32.vlgmr.msrb.gmra.mxu0 %v704_v11 }
 0xa48   :  { %v744_v16 = vpop.f32.mrf.mxu0 }
 0xa49   :  { %v745_v17 = vadd.f32 %v930_v15, %v744_v16 }
 0xa4b   :  { %v747_v18 = vmax.f32 %v745_v17, 0.0 }
 0xa4d   :  { %784 = vmatmul.f32.vlgmr.msra.gmra.mxu1 %v747_v18 }
 0xaca   :  { %v785_v22 = vpop.f32.mrf.mxu1 }
 0xacb   :  { %v786_v23 = vadd.f32 %v931_v21, %v785_v22 }
 0xacd   :  { %v791_v24 = vsel %vm790_vm9, %v786_v23, -1e+30 }
 0xace   :  { %v793_v25 = vsel %vm792_vm10, %v791_v24, -inf }
 0xacf   :  { %794 = vmax.xlane.f32.xlu0 %v793_v25 }
 0xb42   :  { %v795_v26 = vpop.xlane.xlu0 %794 }
 0xb43   :  { %v796_v27 = vsub.f32 %v791_v24, %v795_v26 }
 0xb45   :  { %v797_v28 = vmul.f32 1.442695, %v796_v27 }
 0xb47   :  { %956 = vpow2.f32 %v797_v28 }
 0xb4d   :  { %v957_v29 = vpop.eup %956 }
 0xb4e   :  { %v799_v30 = vsel %vm790_vm9, %v957_v29, 0.0 }
 0xb4f   :  { %v800_v31 = vsel %vm792_vm10, %v799_v30, 0.0 }
 0xb50   :  { %801 = vadd.xlane.f32.xlu0 %v800_v31 }
 0xbc3   :  { %v802_v32 = vpop.xlane.xlu0 %801 }
 0xbc4   :  { %958 = vrcp.f32 %v802_v32  ;;  %v814_v35 = vand.u32 2147483648, %v802_v32  ;;  %v812_v37 = vand.u32 2147483647, %v802_v32  ;;  %vm808_vm12 = vweird.f32 %v802_v32 }
 0xbc6   :  { %v815_v50 = vor.u32 1.1754944e-38, %v814_v35  ;;  %vm813_vm14 = vcmp.eq.f32.partialorder %v812_v37, 8.507059e+37 }
 0xbca   :  { %v959_v33 = vpop.eup %958 }
 0xbcb   :  { %v804_v34 = vmul.f32 %v959_v33, %v802_v32  ;;  %vm809_vm11 = vweird.f32 %v959_v33 }
 0xbcc   :  { %vm810_vm13 = vmor %vm808_vm12, %vm809_vm11 }
 0xbcd   :  { %v805_v43 = vsub.f32 1.0, %v804_v34 }
 0xbcf   :  { %v806_v36 = vmul.f32 %v959_v33, %v805_v43 }
 0xbd1   :  { %v807_v38 = vadd.f32 %v959_v33, %v806_v36 }
 0xbd3   :  { %v811_v39 = vsel %vm810_vm13, %v959_v33, %v807_v38 }
 0xbd4   :  { %v816_v40 = vsel %vm813_vm14, %v815_v50, %v811_v39 }
 0xbd5   :  { %v817_v41 = vmul.f32 %v816_v40, %v799_v30 }
 0xbd7   :  { %818 = vst [vmem:[#allocation13] sm:$0x3] %v817_v41 }
 0xbd8   :  { %829 = dma.vmem_to_hbm [thread:$0]  %s825_s10, 32, %s827_s7, [#allocation4]  }
 0xbd9   :  { %1136 = dma.done.wait [#allocation4], 32  }
 0xbda   :  { %1137 = vsyncadd [#allocation4], 4294967264 }
 0xbdb   :  { %834 = vsyncpa [#allocation3], 1 }
 0xbdc   :  { %835 = vsyncpa [#allocation6], 1 }
 0xbdd   :  { %836 = vsyncpa [#allocation9], 1 }
 0xbde   :  { %837 = vsyncpa [#allocation12], 1 }
 0xbdf   :  { %838 = vsyncpa [#allocation4], 1 }

</bundles_post_ra>
